<compile_context>
chip_gen: v5e
topology: v5e:2x2
jax: 0.10.0
libtpu: 0.0.40
codegen_flags: <defaults>
</compile_context>

<pallas_src>
import math

import jax
import jax.numpy as jnp
from jax.experimental import pallas as pl
from jax.experimental.pallas import tpu as pltpu


def _round_up(a, b):
    return ((a + b - 1) // b) * b


def _device_kind():
    try:
        return jax.devices()[0].device_kind.lower()
    except Exception:
        return ""


_KIND = _device_kind()
_IS_V7 = "v7" in _KIND
# Chips with 2 TensorCores sharing the grid via "parallel" axes.
_MULTI_TC = _IS_V7 or ("v4" in _KIND) or ("v5p" in _KIND)
# v7x has only 64 MiB physical VMEM -> stay well below; v5e/v6e have 128 MiB.
_VMEM_CAP = (44 << 20) if _IS_V7 else (100 << 20)

# Tile caps.  Worst-case working set with these caps is ~17 MiB (bf16 inputs,
# f32 output, double-buffered), comfortably inside every generation's VMEM.
_TM_MAX = 512
_TN_MAX = 1024
_TK_MAX = 2048


def _pick_tile(dim_pad, granule, cap):
    """Largest t <= cap with t % granule == 0 and dim_pad % t == 0."""
    for d in range(max(cap, granule) // granule, 0, -1):
        t = granule * d
        if t <= cap and dim_pad % t == 0:
            return t
    return granule


# ----------------------------- kernels --------------------------------------

def _mm_bias_single_k_kernel(x_ref, wt_ref, b_ref, o_ref):
    """Single K-tile: no accumulator needed at all."""
    acc = jnp.dot(x_ref[...], wt_ref[...], preferred_element_type=jnp.float32)
    o_ref[...] = (acc + b_ref[...]).astype(o_ref.dtype)


def _mm_bias_f32out_kernel(x_ref, wt_ref, b_ref, o_ref):
    """Grid = (M//tm, N//tn, K//tk); f32 output doubles as the accumulator.

    The output block index ignores k, so the block stays VMEM-resident across
    the whole reduction: bias-init at k==0, += each step, no epilogue copy.
    """
    k = pl.program_id(2)

    @pl.when(k == 0)
    def _():
        o_ref[...] = jnp.broadcast_to(b_ref[...], o_ref.shape)

    o_ref[...] += jnp.dot(x_ref[...], wt_ref[...],
                          preferred_element_type=jnp.float32)


def _mm_bias_acc_kernel(x_ref, wt_ref, b_ref, o_ref, acc_ref):
    """Same as above but with an f32 scratch accumulator (non-f32 outputs)."""
    k = pl.program_id(2)

    @pl.when(k == 0)
    def _():
        acc_ref[...] = jnp.broadcast_to(b_ref[...], acc_ref.shape)

    acc_ref[...] += jnp.dot(x_ref[...], wt_ref[...],
                            preferred_element_type=jnp.float32)

    @pl.when(k == pl.num_programs(2) - 1)
    def _():
        o_ref[...] = acc_ref[...].astype(o_ref.dtype)


# ----------------------------- wrapper ---------------------------------------

def _tiled_matmul_bias(xp, wt, b2, *, tm, tn, tk, out_dtype):
    """xp: (M_pad, K_pad), wt: (K_pad, N_pad), b2: (1, N_pad) -> (M_pad, N_pad)."""
    M_pad, K_pad = xp.shape
    K_pad2, N_pad = wt.shape
    assert K_pad == K_pad2
    assert M_pad % tm == 0 and N_pad % tn == 0 and K_pad % tk == 0
    mg, ng, kg = M_pad // tm, N_pad // tn, K_pad // tk

    x_b = jnp.dtype(xp.dtype).itemsize
    w_b = jnp.dtype(wt.dtype).itemsize
    o_b = jnp.dtype(out_dtype).itemsize
    f32_out = jnp.dtype(out_dtype) == jnp.dtype(jnp.float32)

    # 2 pipeline buffers per input + 2 output buffers (+ f32 scratch if used).
    need = (2 * tm * tk * x_b + 2 * tk * tn * w_b + 2 * tn * 4
            + 2 * tm * tn * o_b)
    if kg > 1 and not f32_out:
        need += tm * tn * 4
    vmem_limit = int(min(max(need + (8 << 20), 32 << 20), _VMEM_CAP))

    cost = pl.CostEstimate(
        flops=2 * M_pad * N_pad * K_pad,
        transcendentals=0,
        bytes_accessed=(M_pad * K_pad * x_b + K_pad * N_pad * w_b
                        + N_pad * 4 + M_pad * N_pad * o_b),
    )
    out_shape = jax.ShapeDtypeStruct((M_pad, N_pad), out_dtype)

    if kg == 1:
        # No reduction axis -> 2-D fully parallel grid, no accumulator at all.
        return pl.pallas_call(
            _mm_bias_single_k_kernel,
            out_shape=out_shape,
            grid_spec=pltpu.PrefetchScalarGridSpec(
                num_scalar_prefetch=0,
                grid=(mg, ng),
                in_specs=[
                    pl.BlockSpec((tm, tk), lambda i, j: (i, 0)),
                    pl.BlockSpec((tk, tn), lambda i, j: (0, j)),
                    pl.BlockSpec((1, tn), lambda i, j: (0, j)),
                ],
                out_specs=pl.BlockSpec((tm, tn), lambda i, j: (i, j)),
            ),
            compiler_params=pltpu.CompilerParams(
                dimension_semantics=("parallel", "parallel"),
                vmem_limit_bytes=vmem_limit,
            ),
            cost_estimate=cost,
        )(xp, wt, b2)

    kernel = _mm_bias_f32out_kernel if f32_out else _mm_bias_acc_kernel
    scratch = [] if f32_out else [pltpu.VMEM((tm, tn), jnp.float32)]
    # TODO(synk): if profiling shows exposed DMA on the weight stream (small
    # mg), set pipeline_mode=pl.Buffered(3) on the (tk, tn) weight BlockSpec.
    return pl.pallas_call(
        kernel,
        out_shape=out_shape,
        grid_spec=pltpu.PrefetchScalarGridSpec(
            num_scalar_prefetch=0,
            grid=(mg, ng, kg),
            in_specs=[
                pl.BlockSpec((tm, tk), lambda i, j, k: (i, k)),   # x tile
                pl.BlockSpec((tk, tn), lambda i, j, k: (k, j)),   # w.T tile
                pl.BlockSpec((1, tn), lambda i, j, k: (0, j)),    # bias tile
            ],
            out_specs=pl.BlockSpec((tm, tn), lambda i, j, k: (i, j)),
            scratch_shapes=scratch,
        ),
        compiler_params=pltpu.CompilerParams(
            dimension_semantics=("parallel", "parallel", "arbitrary"),
            vmem_limit_bytes=vmem_limit,
        ),
        cost_estimate=cost,
    )(xp, wt, b2)


def build_sparse_linear(weight, bias, *, compute_dtype=jnp.bfloat16,
                        out_dtype=jnp.float32):
    """Preprocess the static masked weight/bias once; return forward(x) closure.

    weight: (out_features, in_features) f32 dense masked weight.
    bias:   (out_features,) f32.
    """
    N, K = weight.shape

    # Pad each dim only to a 128 granule; tiles are the largest 128-multiple
    # divisors of the padded dims (so padding never doubles a dimension).
    N_pad = _round_up(N, 128)
    K_pad = _round_up(K, 128)
    tn = _pick_tile(N_pad, 128, _TN_MAX)
    tk = _pick_tile(K_pad, 128, _TK_MAX)

    # One-time: transpose to (K, N) so out_features is the lane axis, cast to
    # the MXU-native compute dtype, zero-pad to the 128 granule.
    wt = jnp.zeros((K_pad, N_pad), compute_dtype)
    wt = wt.at[:K, :N].set(jnp.asarray(weight).T.astype(compute_dtype))
    b2 = jnp.zeros((1, N_pad), jnp.float32)
    b2 = b2.at[:, :N].set(jnp.asarray(bias).astype(jnp.float32))

    # TODO(synk): int8 weight + per-output-channel f32 scale path for v5e/v6e
    # (integer MXU, halves weight HBM traffic); v7x MXU is fp8-only so bf16 kept.

    def forward(x):
        x = jnp.asarray(x)
        assert x.shape[-1] == K
        lead = x.shape[:-1]
        x2 = x.reshape(-1, K)
        M = x2.shape[0]

        # Bucket M_pad: multiple of 16 (bf16 sublane packing), coarser buckets
        # for larger M so changing batch sizes doesn't retrace/recompile.
        if M <= 16:
            M_pad = 16
        elif M <= 128:
            M_pad = _round_up(M, 32)
        else:
            M_pad = _round_up(M, 128)
        tm = _pick_tile(M_pad, 16, _TM_MAX)
        tn_eff = tn

        # Guarantee >= 2 steps on the parallel axes on 2-TensorCore chips.
        if _MULTI_TC and (M_pad // tm) * (N_pad // tn_eff) == 1:
            if tn_eff % 256 == 0:
                tn_eff //= 2
            elif tm % 32 == 0:
                tm //= 2

        xp = x2.astype(compute_dtype)
        if (M_pad, K_pad) != (M, K):
            xp = jnp.pad(xp, ((0, M_pad - M), (0, K_pad - K)))

        y = _tiled_matmul_bias(xp, wt, b2, tm=tm, tn=tn_eff, tk=tk,
                               out_dtype=out_dtype)
        if (M_pad, N_pad) != (M, N):
            y = y[:M, :N]
        return y.reshape(*lead, N)

    return forward


# ----------------------- parameter init (reference) --------------------------

def init_sparse_linear_params(key, in_features, out_features, percent=0.5):
    """Deterministic re-implementation of SparseLinear.sparse_random init."""
    k_w, k_b, k_m = jax.random.split(key, 3)

    # kaiming_uniform_(a=sqrt(5)) on (out, in): bound = 1/sqrt(fan_in)
    fan_in = in_features
    w_bound = 1.0 / math.sqrt(fan_in)
    weight = jax.random.uniform(
        k_w, (out_features, in_features), jnp.float32, -w_bound, w_bound
    )

    # random boolean mask with exactly int(percent * total) True entries
    total = in_features * out_features
    num_true = int(percent * total)
    flat = jnp.arange(total) < num_true
    perm = jax.random.permutation(k_m, total)
    mask = flat[perm].reshape(out_features, in_features)
    weight = weight * mask.astype(weight.dtype)

    b_bound = 1.0 / math.sqrt(fan_in)
    bias = jax.random.uniform(k_b, (out_features,), jnp.float32, -b_bound, b_bound)
    return weight, bias


# --------------------------------- demo ---------------------------------------

if __name__ == "__main__":
    key = jax.random.PRNGKey(0)
    k_init, k_x, k_init2, k_x2 = jax.random.split(key, 4)

    # 1) Small shapes consistent with the module (single-K fast path).
    batch, in_features, out_features = 8, 32, 32
    weight, bias = init_sparse_linear_params(k_init, in_features, out_features, 0.5)
    x = jax.random.normal(k_x, (batch, in_features), jnp.float32)

    fwd = build_sparse_linear(weight, bias)
    y = jax.block_until_ready(fwd(x))

    xb = x.astype(jnp.bfloat16).astype(jnp.float32)
    wb = weight.astype(jnp.bfloat16).astype(jnp.float32)
    ref_bf16 = xb @ wb.T + bias          # same-precision reference (tight tol)
    ref_f32 = x @ weight.T + bias        # module-math reference (loose tol)
    assert y.shape == (batch, out_features)
    assert jnp.allclose(y, ref_bf16, atol=1e-4, rtol=1e-4)
    assert jnp.allclose(y, ref_f32, atol=5e-2, rtol=5e-2)

    # 2) Non-aligned shapes: exercises padding / divisor tile selection.
    batch2, in2, out2 = 5, 200, 300
    weight2, bias2 = init_sparse_linear_params(k_init2, in2, out2, 0.5)
    x2 = jax.random.normal(k_x2, (batch2, in2), jnp.float32)
    y2 = jax.block_until_ready(build_sparse_linear(weight2, bias2)(x2))
    ref2 = (x2.astype(jnp.bfloat16).astype(jnp.float32)
            @ weight2.astype(jnp.bfloat16).astype(jnp.float32).T + bias2)
    assert y2.shape == (batch2, out2)
    assert jnp.allclose(y2, ref2, atol=1e-4, rtol=1e-4)

    # 3) Multi-K-tile path, f32 output accumulated directly into o_ref.
    k_a, k_w3 = jax.random.split(k_x2)
    xa = jax.random.normal(k_a, (16, 256), jnp.float32).astype(jnp.bfloat16)
    wa = jax.random.normal(k_w3, (256, 128), jnp.float32).astype(jnp.bfloat16)
    ba = jnp.zeros((1, 128), jnp.float32)
    y3 = jax.block_until_ready(
        _tiled_matmul_bias(xa, wa, ba, tm=16, tn=128, tk=128,
                           out_dtype=jnp.float32))
    ref3 = xa.astype(jnp.float32) @ wa.astype(jnp.float32)
    assert jnp.allclose(y3, ref3, atol=1e-2, rtol=1e-2)

    # 4) Multi-K-tile path with bf16 output (scratch-accumulator kernel).
    y4 = jax.block_until_ready(
        _tiled_matmul_bias(xa, wa, ba, tm=16, tn=128, tk=128,
                           out_dtype=jnp.bfloat16))
    assert jnp.allclose(y4.astype(jnp.float32), ref3, atol=2e-1, rtol=2e-2)

    print("KERNEL_OK")
</pallas_src>

<mosaic_0001>
module attributes {stable_mosaic.version = 11 : i64} {
  func.func @_mm_bias_single_k_kernel(%arg0: i32, %arg1: i32, %arg2: memref<16x128xbf16, #tpu.memory_space<vmem>>, %arg3: memref<128x128xbf16, #tpu.memory_space<vmem>>, %arg4: memref<1x128xf32, #tpu.memory_space<vmem>>, %arg5: memref<16x128xf32, #tpu.memory_space<vmem>>) attributes {dimension_semantics = [#tpu.dimension_semantics<parallel>, #tpu.dimension_semantics<parallel>], iteration_bounds = array<i64: 1, 1>, scalar_prefetch = 0 : i64, scratch_operands = 0 : i64, tpu.core_type = #tpu.core_type<tc>, window_params = [{transform_indices = @transform_0, window_bounds = array<i64: 16, 128>}, {transform_indices = @transform_1, window_bounds = array<i64: 128, 128>}, {transform_indices = @transform_2, window_bounds = array<i64: 1, 128>}, {transform_indices = @transform_3, window_bounds = array<i64: 16, 128>}]} {
    %c0 = arith.constant 0 : index
    %c0_0 = arith.constant 0 : index
    %0 = vector.load %arg2[%c0, %c0_0] : memref<16x128xbf16, #tpu.memory_space<vmem>>, vector<16x128xbf16>
    %c0_1 = arith.constant 0 : index
    %c0_2 = arith.constant 0 : index
    %1 = vector.load %arg3[%c0_1, %c0_2] : memref<128x128xbf16, #tpu.memory_space<vmem>>, vector<128x128xbf16>
    %cst = arith.constant dense<0.000000e+00> : vector<16x128xf32>
    %2 = tpu.matmul %0, %1, %cst {dimension_numbers = #tpu.dot_dimension_numbers<[1], [0], [0], [1], [0, 0, 1, 1], [], []>} : vector<16x128xbf16>, vector<128x128xbf16>, vector<16x128xf32> -> vector<16x128xf32>
    %c0_3 = arith.constant 0 : index
    %c0_4 = arith.constant 0 : index
    %3 = vector.load %arg4[%c0_3, %c0_4] : memref<1x128xf32, #tpu.memory_space<vmem>>, vector<1x128xf32>
    %4 = vector.broadcast %3 : vector<1x128xf32> to vector<16x128xf32>
    %5 = arith.addf %2, %4 : vector<16x128xf32>
    %c0_5 = arith.constant 0 : index
    %c0_6 = arith.constant 0 : index
    %6 = vector.load %arg5[%c0_5, %c0_6] : memref<16x128xf32, #tpu.memory_space<vmem>>, vector<16x128xf32>
    tpu.vector_store %arg5[%c0_5, %c0_6], %5 {strides = array<i32>} : memref<16x128xf32, #tpu.memory_space<vmem>>, vector<16x128xf32>,
    return
  }
  func.func @transform_0(%arg0: i32, %arg1: i32) -> (i32, i32) {
    %c0_i32 = arith.constant 0 : i32
    %c0_i32_0 = arith.constant 0 : i32
    return %arg0, %c0_i32 : i32, i32
  }
  func.func @transform_1(%arg0: i32, %arg1: i32) -> (i32, i32) {
    %c0_i32 = arith.constant 0 : i32
    %c0_i32_0 = arith.constant 0 : i32
    return %c0_i32, %arg1 : i32, i32
  }
  func.func @transform_2(%arg0: i32, %arg1: i32) -> (i32, i32) {
    %c0_i32 = arith.constant 0 : i32
    %c0_i32_0 = arith.constant 0 : i32
    return %c0_i32, %arg1 : i32, i32
  }
  func.func @transform_3(%arg0: i32, %arg1: i32) -> (i32, i32) {
    %c0_i32 = arith.constant 0 : i32
    return %arg0, %arg1 : i32, i32
  }
}

</mosaic_0001>

<bundles_post_ra>
// kernel: tpu_custom_call.1
= control target key start
LH: loop header
LB: loop body
LE: loop exit
PB: predicated region body
PF: predicated region fallthrough
CT: control target
= control target key end

     0   :  { %8 = vsyncpa [#allocation3], 0  ;;  %s329_s0 = inlined_call_operand.hbm [shape: bf16[16,128], index: 0, kind: input, shape index: {}]   ;;  %s330_s1 = inlined_call_operand.hbm [shape: bf16[128,128], index: 1, kind: input, shape index: {}]   ;;  %s331_s2 = inlined_call_operand.vmem [shape: f32[1,128], index: 2, kind: input, shape index: {}]   ;;  %s332_s3 = inlined_call_operand.hbm [shape: f32[16,128], index: 3, kind: output, shape index: {}]  }
   0x1   :  { %9 = vsyncpa [#allocation6], 0 }
   0x2   :  { %10 = vsyncpa [#allocation4], 0  ;;  %s15_s14 = sshll.u32 %s329_s0, 4  ;;  %s290_s15 = smov [#allocation2]   ;;  %s16_s14 = int_to_ptr.hbm [resolvable:$true] %s15_s14 }
   0x3   :  { %s17_s16 = sshll.u32 %s290_s15, 4  ;;  %s28_s19 = sshll.u32 %s330_s1, 4  ;;  %s18_s16 = int_to_ptr.vmem [resolvable:$true] %s17_s16  ;;  %s29_s19 = int_to_ptr.hbm [resolvable:$true] %s28_s19 }
   0x4   :  { %s291_s20 = smov 64   ;;  %s292_s21 = smov 4  }
   0x5   :  { %23 = dma.hbm_to_vmem [thread:$0]  %s16_s14, 128, %s18_s16, [#allocation3], %s291_s20, %s291_s20, %s292_s21  }
   0x6   :  { %s293_s22 = smov [#allocation5]  }
   0x7   :  { %s30_s23 = sshll.u32 %s293_s22, 4  ;;  %s31_s23 = int_to_ptr.vmem [resolvable:$true] %s30_s23 }
   0x8   :  { %36 = dma.hbm_to_vmem [thread:$0]  %s29_s19, 1024, %s31_s23, [#allocation6], %s291_s20, %s291_s20, %s292_s21  }
   0x9   :  { %284 = dma.done.wait [#allocation3], 128  }
   0xa   :  { %285 = vsyncadd [#allocation3], 4294967168 }
   0xb   :  { %286 = dma.done.wait [#allocation6], 1024  }
   0xc   :  { %287 = vsyncadd [#allocation6], 4294966272  ;;  %v203_v0 = vld [vmem:[#allocation5 + $0x38] sm:$0xff]  ;;  %v202_v1 = vld [vmem:[#allocation5 + $0x30] sm:$0xff]  ;;  %s294_s24 = smov [#allocation7]   ;;  %s145_s28 = sshll.u32 %s332_s3, 4  ;;  %s146_s28 = int_to_ptr.hbm [resolvable:$true] %s145_s28 }
   0xd   :  { %123 = vmatpush.bf16.msra.mxu0 %v203_v0  ;;  %v201_v2 = vld [vmem:[#allocation5 + $0x28] sm:$0xff]  ;;  %v200_v3 = vld [vmem:[#allocation5 + $0x20] sm:$0xff]  ;;  %v199_v4 = vld [vmem:[#allocation5 + $0x18] sm:$0xff]  ;;  %s143_s25 = sshll.u32 %s294_s24, 4  ;;  %s295_s29 = smov 128   ;;  %s144_s25 = int_to_ptr.vmem [resolvable:$true] %s143_s25 }
   0xe   :  { %v198_v5 = vld [vmem:[#allocation5 + $0x10] sm:$0xff]  ;;  %v197_v6 = vld [vmem:[#allocation5 + $0x8] sm:$0xff]  ;;  %v196_v7 = vld [vmem:[#allocation5] sm:$0xff]  ;;  %s296_s30 = smov 8  }
   0xf   :  { %v195_v8 = vld [vmem:[#allocation2] sm:$0xff] }
  0x10   :  { %v211_v9 = vld [vmem:[%s331_s2] ss:$0 sm:$0xff] }
  0x11   :  { %124 = vmatpush.bf16.msra.mxu0 %v202_v1 }
  0x15   :  { %125 = vmatpush.bf16.msra.mxu0 %v201_v2 }
  0x19   :  { %126 = vmatpush.bf16.msra.mxu0 %v200_v3 }
  0x1d   :  { %127 = vmatpush.bf16.msra.mxu0 %v199_v4 }
  0x21   :  { %128 = vmatpush.bf16.msra.mxu0 %v198_v5 }
  0x25   :  { %129 = vmatpush.bf16.msra.mxu0 %v197_v6 }
  0x29   :  { %130 = vmatpush.bf16.msra.mxu0 %v196_v7 }
  0x2c   :  { %131 = vmatmul.bf16.vlgmr.msra.gmra.mxu0 %v195_v8 }
  0xa9   :  { %v132_v10 = vpop.f32.mrf.mxu0 }
  0xaa   :  { %v133_v11 = vadd.f32 %v211_v9, %v132_v10 }
  0xac   :  { %137 = vst [vmem:[#allocation7] sm:$0xff] %v133_v11 }
  0xb1   :  { %v134_v12 = vpop.f32.mrf.mxu0 }
  0xb2   :  { %v135_v13 = vadd.f32 %v211_v9, %v134_v12 }
  0xb4   :  { %138 = vst [vmem:[#allocation7 + $0x8] sm:$0xff] %v135_v13 }
  0xb5   :  { %151 = dma.vmem_to_hbm [thread:$0]  %s144_s25, 256, %s146_s28, [#allocation4], %s295_s29, %s295_s29, %s296_s30  }
  0xb6   :  { %288 = dma.done.wait [#allocation4], 256  }
  0xb7   :  { %289 = vsyncadd [#allocation4], 4294967040 }
  0xb8   :  { %156 = vsyncpa [#allocation3], 1 }
  0xb9   :  { %157 = vsyncpa [#allocation6], 1 }
  0xba   :  { %158 = vsyncpa [#allocation4], 1 }

</bundles_post_ra>
